<compile_context>
chip_gen: v6e
topology: v6e:2x2x1
jax: 0.10.0
libtpu: 0.0.40
codegen_flags: <defaults>
</compile_context>

<pallas_src>
import math
import functools

import jax
import jax.numpy as jnp
from jax.experimental import pallas as pl
from jax.experimental.pallas import tpu as pltpu

SCALE = 0.05  # fixed std of the policy's Normal distribution
_MAX_TB = 32768  # cap on batch-tile rows (VMEM stays far below limits up to here)


def _round_up(x, m):
    return ((x + m - 1) // m) * m


def _net_kernel(xT_ref, w1_ref, b1_ref, w2_ref, b2_ref, meanT_ref):
    # xT_ref:    (n_in,  TB)   batch on the lane axis (TB = multiple of 128)
    # w1_ref:    (n_hid, n_in) PyTorch layout, feeds MXU directly
    # b1_ref:    (n_hid, 1)
    # w2_ref:    (n_out, n_hid)
    # b2_ref:    (n_out, 1)
    # meanT_ref: (n_out, TB)   lane-dense output store
    xT = xT_ref[...]

    # linear1 + relu, batch stays on lanes
    h = jnp.dot(w1_ref[...], xT, preferred_element_type=jnp.float32) + b1_ref[...]
    h = jnp.maximum(h, 0.0)                                   # (n_hid, TB)

    # linear2 + tanh -> mean of the Normal (transposed)
    meanT_ref[...] = jnp.tanh(
        jnp.dot(w2_ref[...], h, preferred_element_type=jnp.float32) + b2_ref[...]
    )


@functools.partial(jax.jit, static_argnames=("tb",))
def net_forward(x, w1, b1, w2, b2, eps, tb=None):
    """Returns (sampled_action, sampled_log_prob, mean).

    w1: (n_hidden, n_input), b1: (n_hidden,), w2: (n_output, n_hidden),
    b2: (n_output,)  -- PyTorch nn.Linear layout (used as-is by the kernel).
    eps: standard-normal noise, shape (B, n_output).
    """
    B, n_in = x.shape
    n_hid = w1.shape[0]
    n_out = w2.shape[0]

    # Batch tile = lane axis: multiple of 128.  Default: 1 grid step for small
    # batches, exactly 2 parallel steps otherwise (both TCs on v7x).
    if tb is None:
        if B <= 128:
            tb = 128
        else:
            tb = min(_round_up(-(-B // 2), 128), _MAX_TB)
    else:
        tb = _round_up(tb, 128)
    b_pad = _round_up(B, tb)
    grid = (b_pad // tb,)

    # Present the batch on the lane axis; zero-pad extra columns (finite, sliced off).
    xT = jnp.transpose(x)  # (n_in, B)
    if b_pad != B:
        xT = jnp.pad(xT, ((0, 0), (0, b_pad - B)))

    b1_col = b1.reshape(n_hid, 1)
    b2_col = b2.reshape(n_out, 1)

    cost = pl.CostEstimate(
        flops=2 * b_pad * (n_in * n_hid + n_hid * n_out),
        transcendentals=b_pad * n_out,
        bytes_accessed=4 * (n_in * b_pad + n_out * b_pad
                            + n_hid * n_in + n_hid + n_out * n_hid + n_out),
    )

    meanT = pl.pallas_call(
        _net_kernel,
        out_shape=jax.ShapeDtypeStruct((n_out, b_pad), jnp.float32),
        grid=grid,
        in_specs=[
            pl.BlockSpec((n_in, tb), lambda i: (0, i)),       # xT      (batch-tiled, lane-dense)
            pl.BlockSpec((n_hid, n_in), lambda i: (0, 0)),    # w1      (resident)
            pl.BlockSpec((n_hid, 1), lambda i: (0, 0)),       # b1
            pl.BlockSpec((n_out, n_hid), lambda i: (0, 0)),   # w2
            pl.BlockSpec((n_out, 1), lambda i: (0, 0)),       # b2
        ],
        out_specs=pl.BlockSpec((n_out, tb), lambda i: (0, i)),
        compiler_params=pltpu.CompilerParams(
            dimension_semantics=("parallel",),                # 2 TCs on v7x, no-op on v5e/v6e
        ),
        cost_estimate=cost,
    )(xT, w1, b1_col, w2, b2_col)

    mean = jnp.transpose(meanT)[:B]          # (B, n_out)
    action = mean + SCALE * eps              # rsample, detached

    # logp computed algebraically from eps alone (action - mean == SCALE*eps):
    #   logp = -0.5 * sum_j eps_j^2 + n_out * (-log(SCALE) - 0.5*log(2*pi))
    logp_const = n_out * (-math.log(SCALE) - 0.5 * math.log(2.0 * math.pi))
    logp = -0.5 * jnp.sum(eps * eps, axis=1, keepdims=True) + logp_const

    # TODO(synk): torch.distributions.Normal object has no kernel equivalent;
    # callers reconstruct it from (mean, SCALE).
    return action, logp, mean


if __name__ == "__main__":
    # Small HalfCheetah-like MLP shapes; batch large enough to exercise the 2-step grid.
    B, n_input, n_hidden, n_output = 512, 16, 32, 8

    key = jax.random.PRNGKey(0)
    kx, kw1, kb1, kw2, kb2, keps = jax.random.split(key, 6)

    x = jax.random.normal(kx, (B, n_input), dtype=jnp.float32)

    # Deterministic synthetic parameters (PyTorch nn.Linear layout: (out, in)).
    w1 = 0.1 * jax.random.normal(kw1, (n_hidden, n_input), dtype=jnp.float32)
    b1 = 0.1 * jax.random.normal(kb1, (n_hidden,), dtype=jnp.float32)
    w2 = 0.1 * jax.random.normal(kw2, (n_output, n_hidden), dtype=jnp.float32)
    b2 = 0.1 * jax.random.normal(kb2, (n_output,), dtype=jnp.float32)

    # Reparameterization noise (generated outside the kernel, deterministic).
    eps = jax.random.normal(keps, (B, n_output), dtype=jnp.float32)

    action, logp, mean = net_forward(x, w1, b1, w2, b2, eps)
    jax.block_until_ready((action, logp, mean))

    # Reference check in plain JAX (PyTorch-formula log_prob).
    h_ref = jnp.maximum(x @ w1.T + b1, 0.0)
    mean_ref = jnp.tanh(h_ref @ w2.T + b2)
    action_ref = mean_ref + SCALE * eps
    lp_ref = (-((action_ref - mean_ref) ** 2) / (2 * SCALE * SCALE)
              - math.log(SCALE) - 0.5 * math.log(2 * math.pi)).sum(axis=1, keepdims=True)

    assert jnp.allclose(action, action_ref, atol=1e-5)
    assert jnp.allclose(mean, mean_ref, atol=1e-5)
    assert jnp.allclose(logp, lp_ref, atol=1e-4)

    print("KERNEL_OK")
</pallas_src>

<mosaic_0001>
module attributes {stable_mosaic.version = 11 : i64} {
  func.func @_net_kernel(%arg0: i32, %arg1: memref<16x256xf32, #tpu.memory_space<vmem>>, %arg2: memref<32x16xf32, #tpu.memory_space<vmem>>, %arg3: memref<32x1xf32, #tpu.memory_space<vmem>>, %arg4: memref<8x32xf32, #tpu.memory_space<vmem>>, %arg5: memref<8x1xf32, #tpu.memory_space<vmem>>, %arg6: memref<8x256xf32, #tpu.memory_space<vmem>>) attributes {dimension_semantics = [#tpu.dimension_semantics<parallel>], iteration_bounds = array<i64: 2>, scalar_prefetch = 0 : i64, scratch_operands = 0 : i64, tpu.core_type = #tpu.core_type<tc>, window_params = [{transform_indices = @transform_0, window_bounds = array<i64: 16, 256>}, {pipeline_mode = #tpu.pipeline_mode<synchronous>, transform_indices = @transform_1, window_bounds = array<i64: 32, 16>}, {pipeline_mode = #tpu.pipeline_mode<synchronous>, transform_indices = @transform_2, window_bounds = array<i64: 32, 1>}, {pipeline_mode = #tpu.pipeline_mode<synchronous>, transform_indices = @transform_3, window_bounds = array<i64: 8, 32>}, {pipeline_mode = #tpu.pipeline_mode<synchronous>, transform_indices = @transform_4, window_bounds = array<i64: 8, 1>}, {transform_indices = @transform_5, window_bounds = array<i64: 8, 256>}]} {
    %c0 = arith.constant 0 : index
    %c0_0 = arith.constant 0 : index
    %0 = vector.load %arg1[%c0, %c0_0] : memref<16x256xf32, #tpu.memory_space<vmem>>, vector<16x256xf32>
    %c0_1 = arith.constant 0 : index
    %c0_2 = arith.constant 0 : index
    %1 = vector.load %arg2[%c0_1, %c0_2] : memref<32x16xf32, #tpu.memory_space<vmem>>, vector<32x16xf32>
    %cst = arith.constant dense<0.000000e+00> : vector<32x256xf32>
    %2 = tpu.matmul %1, %0, %cst {dimension_numbers = #tpu.dot_dimension_numbers<[1], [0], [0], [1], [0, 0, 1, 1], [], []>} : vector<32x16xf32>, vector<16x256xf32>, vector<32x256xf32> -> vector<32x256xf32>
    %c0_3 = arith.constant 0 : index
    %c0_4 = arith.constant 0 : index
    %3 = vector.load %arg3[%c0_3, %c0_4] : memref<32x1xf32, #tpu.memory_space<vmem>>, vector<32x1xf32>
    %4 = vector.broadcast %3 : vector<32x1xf32> to vector<32x256xf32>
    %5 = arith.addf %2, %4 : vector<32x256xf32>
    %cst_5 = arith.constant 0.000000e+00 : f32
    %6 = vector.broadcast %cst_5 : f32 to vector<32x256xf32>
    %7 = arith.maximumf %5, %6 : vector<32x256xf32>
    %c0_6 = arith.constant 0 : index
    %c0_7 = arith.constant 0 : index
    %8 = vector.load %arg4[%c0_6, %c0_7] : memref<8x32xf32, #tpu.memory_space<vmem>>, vector<8x32xf32>
    %cst_8 = arith.constant dense<0.000000e+00> : vector<8x256xf32>
    %9 = tpu.matmul %8, %7, %cst_8 {dimension_numbers = #tpu.dot_dimension_numbers<[1], [0], [0], [1], [0, 0, 1, 1], [], []>} : vector<8x32xf32>, vector<32x256xf32>, vector<8x256xf32> -> vector<8x256xf32>
    %c0_9 = arith.constant 0 : index
    %c0_10 = arith.constant 0 : index
    %10 = vector.load %arg5[%c0_9, %c0_10] : memref<8x1xf32, #tpu.memory_space<vmem>>, vector<8x1xf32>
    %11 = vector.broadcast %10 : vector<8x1xf32> to vector<8x256xf32>
    %12 = arith.addf %9, %11 : vector<8x256xf32>
    %13 = math.tanh %12 : vector<8x256xf32>
    %c0_11 = arith.constant 0 : index
    %c0_12 = arith.constant 0 : index
    %14 = vector.load %arg6[%c0_11, %c0_12] : memref<8x256xf32, #tpu.memory_space<vmem>>, vector<8x256xf32>
    tpu.vector_store %arg6[%c0_11, %c0_12], %13 {strides = array<i32>} : memref<8x256xf32, #tpu.memory_space<vmem>>, vector<8x256xf32>,
    return
  }
  func.func @transform_0(%arg0: i32) -> (i32, i32) {
    %c0_i32 = arith.constant 0 : i32
    %c0_i32_0 = arith.constant 0 : i32
    return %c0_i32, %arg0 : i32, i32
  }
  func.func @transform_1(%arg0: i32) -> (i32, i32) {
    %c0_i32 = arith.constant 0 : i32
    %c0_i32_0 = arith.constant 0 : i32
    %c0_i32_1 = arith.constant 0 : i32
    return %c0_i32, %c0_i32_0 : i32, i32
  }
  func.func @transform_2(%arg0: i32) -> (i32, i32) {
    %c0_i32 = arith.constant 0 : i32
    %c0_i32_0 = arith.constant 0 : i32
    %c0_i32_1 = arith.constant 0 : i32
    return %c0_i32, %c0_i32_0 : i32, i32
  }
  func.func @transform_3(%arg0: i32) -> (i32, i32) {
    %c0_i32 = arith.constant 0 : i32
    %c0_i32_0 = arith.constant 0 : i32
    %c0_i32_1 = arith.constant 0 : i32
    return %c0_i32, %c0_i32_0 : i32, i32
  }
  func.func @transform_4(%arg0: i32) -> (i32, i32) {
    %c0_i32 = arith.constant 0 : i32
    %c0_i32_0 = arith.constant 0 : i32
    %c0_i32_1 = arith.constant 0 : i32
    return %c0_i32, %c0_i32_0 : i32, i32
  }
  func.func @transform_5(%arg0: i32) -> (i32, i32) {
    %c0_i32 = arith.constant 0 : i32
    %c0_i32_0 = arith.constant 0 : i32
    return %c0_i32, %arg0 : i32, i32
  }
}

</mosaic_0001>

<bundles_post_ra>
// kernel: net_forward.1
= control target key start
LH: loop header
LB: loop body
LE: loop exit
PB: predicated region body
PF: predicated region fallthrough
CT: control target
= control target key end

     0   :  { %s650_s18 = smov 0   ;;  %s652_s19 = smov 0   ;;  %s736_s0 = inlined_call_operand.vmem [shape: f32[16,512], index: 0, kind: input, shape index: {}]   ;;  %s737_s1 = inlined_call_operand.vmem [shape: f32[32,16], index: 1, kind: input, shape index: {}]   ;;  %s738_s2 = inlined_call_operand.vmem [shape: f32[32,1], index: 2, kind: input, shape index: {}]   ;;  %s739_s3 = inlined_call_operand.vmem [shape: f32[8,32], index: 3, kind: input, shape index: {}]   ;;  %s740_s4 = inlined_call_operand.vmem [shape: f32[8,1], index: 4, kind: input, shape index: {}]   ;;  %s741_s5 = inlined_call_operand.vmem [shape: f32[8,512], index: 5, kind: output, shape index: {}]  }
   0x1   :  { %s654_s20 = smov 0  }
   0x2 LB: > { %s543_s21 = sadd.s32 4294967295, %s616_s20   ;;  %s667_s22 = sadd.s32 1, %s616_s20   ;;  %s616_s20 = sphi %s654_s20, %s744_s20   ;;  %s612_s19 = sphi %s652_s19, %s743_s19   ;;  %s608_s18 = sphi %s650_s18, %s742_s18  }
   0x3   : > { %s19_s23 = ssub.s32 %s616_s20, %s667_s22  ;;  %s22_s24 = sadd.s32 1, %s612_s19 }
   0x4   : > { %p20_p0 = scmp.eq.s32.totalorder %s19_s23, 0  ;;  %p29_p1 = scmp.ne.s32.totalorder %s612_s19, %s608_s18 }
   0x5   : > { %p30_p2 = scmp.eq.s32.totalorder %s616_s20, 0  ;;  %p546_p4 = scmp.ge.s32.totalorder %s616_s20, 2 }
   0x6   : > { %s676_s25 = scalar_select %p20_p0, %s612_s19, %s22_s24  }
   0x7   : > { %p31_p3 = por %p30_p2, %p29_p1  ;;  %177 = sbr.rel (%p546_p4) target bundleno = 18 (0x12), region = 32 }
   0xc   : > { %180 = sbr.rel (!%p31_p3) target bundleno = 18 (0x12), region = 36  ;;  %s182_s26 = sand.u32 (%p31_p3), 1, %s612_s19  }
   0xd   : > { %s561_s27 = sshll.u32 (%p31_p3), %s616_s20, 4  ;;  %s547_s28 = sshll.u32 (%p31_p3), %s182_s26, 5 }
   0xe   : > { %s187_s6 = scalar_lea.vmem (%p31_p3), %s736_s0, %s561_s27  ;;  %s184_s7 = scalar_lea.vmem (%p31_p3), [#allocation2], %s547_s28 }
   0xf   : > { %v200_v0 = vld [vmem:[%s187_s6] sm:$0xff] (%p31_p3)  ;;  %v202_v1 = vld [vmem:[%s187_s6 + $0x8] sm:$0xff] (%p31_p3) }
  0x10   : > { %v204_v2 = vld [vmem:[%s187_s6 + $0x20] sm:$0xff] (%p31_p3)  ;;  %201 = vst [vmem:[%s184_s7] sm:$0xff] (%p31_p3), %v200_v0  ;;  %203 = vst [vmem:[%s184_s7 + $0x8] sm:$0xff] (%p31_p3), %v202_v1  ;;  %v206_v3 = vld [vmem:[%s187_s6 + $0x28] sm:$0xff] (%p31_p3) }
  0x11   : > { %205 = vst [vmem:[%s184_s7 + $0x10] sm:$0xff] %v204_v2  ;;  %207 = vst [vmem:[%s184_s7 + $0x18] sm:$0xff] %v206_v3 }
  0x12 PF: > { %p550_p5 = scmp.ge.s32.totalorder %s616_s20, 1  ;;  %p212_p6 = scmp.lt.s32.totalorder %s616_s20, 3 }
  0x14   : > { %p213_p7 = pnand %p550_p5, %p212_p6 }
  0x15   : > { %s219_s8 = sand.u32 (!%p213_p7), 1, %s608_s18   ;;  %s552_s11 = sshll.u32 (!%p213_p7), %s543_s21, 1 }
  0x16   : > { %216 = sbr.rel (%p213_p7) target bundleno = 466 (0x1d2), region = 59  ;;  %s551_s9 = sshll.u32 (!%p213_p7), %s219_s8, 5 }
  0x17   : > { %s221_s14 = scalar_lea.vmem (!%p213_p7), [#allocation2], %s551_s9  ;;  %p248_p8 = scmp.lt.s32.totalorder (!%p213_p7), %s552_s11, 3 }
  0x1b   : > { %v618_v4 = vmov 0.0   ;;  %v262_v5 = vld [vmem:[%s738_s2 + $0x8] sm:$0xff]  ;;  %v619_v6 = vmov 0   ;;  %v264_v7 = vld [vmem:[%s738_s2 + $0x18] sm:$0xff]  ;;  %v255_v9 = vld [vmem:[%s221_s14 + $0x10] sm:$0xff]  ;;  %vm285_vm0 = vcmask 130048  }
  0x1c   : > { %362 = vmatprep.mubr.f32.mxu0 %v618_v4  ;;  %470 = vmatprep.mubr.f32.mxu1 %v618_v4  ;;  %v256_v8 = vld [vmem:[%s221_s14 + $0x18] sm:$0xff]  ;;  %v254_v10 = vld [vmem:[%s221_s14 + $0x8] sm:$0xff]  ;;  %v253_v11 = vld [vmem:[%s221_s14] sm:$0xff]  ;;  %vm402_vm1 = vcmask 261120   ;;  %s746_s11 = smov (!%p248_p8, %s552_s11), 3 }
  0x1d   : > { %589 = vset.pattern.permute.xlu1 %v619_v6  ;;  %588 = vset.pattern.permute.xlu0 %v619_v6  ;;  %v261_v12 = vld [vmem:[%s738_s2] sm:$0xff]  ;;  %v263_v14 = vld [vmem:[%s738_s2 + $0x10] sm:$0xff]  ;;  %v258_v15 = vld [vmem:[%s737_s1 + $0x8] sm:$0xff]  ;;  %s553_s12 = sshll.u32 %s746_s11, 3 }
  0x1e   : > { %272 = vperm.xlu1 %589, %v262_v5   ;;  %282 = vperm.xlu0 %588, %v264_v7   ;;  %v257_v13 = vld [vmem:[%s737_s1] sm:$0xff]  ;;  %v259_v17 = vld [vmem:[%s737_s1 + $0x10] sm:$0xff]  ;;  %v260_v18 = vld [vmem:[%s737_s1 + $0x18] sm:$0xff]  ;;  %s251_s15 = scalar_lea.vmem %s741_s5, %s553_s12 }
  0x1f   : > { %326 = vmatprep.subr.mxu0 %v256_v8  ;;  %v396_v16 = vld [vmem:[%s740_s4] sm:$0xff] }
  0x20   : > { %327 = vmatpush1.msra.mxu0 %v255_v9  ;;  %v395_v47 = vld [vmem:[%s739_s3] sm:$0xff] }
  0x21   : > { %328 = vmatprep.subr.mxu0 %v254_v10 }
  0x22   : > { %329 = vmatpush1.msra.mxu0 %v253_v11  ;;  %267 = vperm.xlu1 %589, %v261_v12  }
  0x23   : > { %554 = vmatmul.mubr.msk.f32.vlgmr.msra.gmra.mxu0 %vm285_vm0, %v257_v13  ;;  %277 = vperm.xlu0 %588, %v263_v14  }
  0x24   : > { %368 = vmatprep.mubr.f32.mxu0 %v618_v4 }
  0x27   : > { %555 = vmatmul.mubr.msk.f32.gmra.mxu0 %vm285_vm0, %v258_v15  ;;  %399 = vperm.xlu0 %588, %v396_v16  }
  0x28   : > { %374 = vmatprep.mubr.f32.mxu0 %v618_v4 }
  0x2b   : > { %556 = vmatmul.mubr.msk.f32.gmra.mxu0 %vm285_vm0, %v259_v17 }
  0x2c   : > { %380 = vmatprep.mubr.f32.mxu0 %v618_v4 }
  0x2f   : > { %557 = vmatmul.mubr.msk.f32.gmra.mxu0 %vm285_vm0, %v260_v18 }
  0x99   : > { %v283_v23 = vpop.permute.xlu0 %282  ;;  %v273_v26 = vpop.permute.xlu1 %272 }
  0x9d   : > { %v268_v34 = vpop.permute.xlu1 %267 }
  0x9e   : > { %v278_v28 = vpop.permute.xlu0 %277 }
  0xa2   : > { %v400_v48 = vpop.permute.xlu0 %399 }
  0xe3   : > { %v364_v19 = vpop.f32.mrf.mxu0 }
  0xe4   : > { %v365_v41 = vadd.f32 %v364_v19, %v268_v34 }
  0xe5   : > { %v366_v20 = vpop.f32.mrf.mxu0 }
  0xe6   : > { %v367_v39 = vadd.f32 %v366_v20, %v268_v34  ;;  %v387_v46 = vmax.f32 %v365_v41, 0.0 }
  0xe7   : > { %v370_v21 = vpop.f32.mrf.mxu0 }
  0xe8   : > { %v371_v37 = vadd.f32 %v370_v21, %v273_v26  ;;  %v388_v45 = vmax.f32 %v367_v39, 0.0 }
  0xe9   : > { %v372_v22 = vpop.f32.mrf.mxu0 }
  0xea   : > { %v373_v35 = vadd.f32 %v372_v22, %v273_v26  ;;  %v389_v44 = vmax.f32 %v371_v37, 0.0 }
  0xeb   : > { %v376_v24 = vpop.f32.mrf.mxu0 }
  0xec   : > { %v377_v33 = vadd.f32 %v376_v24, %v278_v28  ;;  %v390_v43 = vmax.f32 %v373_v35, 0.0 }
  0xed   : > { %v378_v25 = vpop.f32.mrf.mxu0 }
  0xee   : > { %v379_v31 = vadd.f32 %v378_v25, %v278_v28  ;;  %v391_v42 = vmax.f32 %v377_v33, 0.0 }
  0xef   : > { %v382_v27 = vpop.f32.mrf.mxu0 }
  0xf0   : > { %v383_v29 = vadd.f32 %v382_v27, %v283_v23  ;;  %v392_v40 = vmax.f32 %v379_v31, 0.0 }
  0xf1   : > { %v384_v30 = vpop.f32.mrf.mxu0 }
  0xf2   : > { %v385_v32 = vadd.f32 %v384_v30, %v283_v23  ;;  %v393_v38 = vmax.f32 %v383_v29, 0.0 }
  0xf4   : > { %v394_v36 = vmax.f32 %v385_v32, 0.0 }
  0xf6   : > { %430 = vmatprep.subr.mxu1 %v394_v36 }
  0xf7   : > { %431 = vmatpush1.msra.mxu1 %v393_v38 }
  0xf8   : > { %432 = vmatprep.subr.mxu1 %v392_v40 }
  0xf9   : > { %433 = vmatpush1.msra.mxu1 %v391_v42 }
  0xfa   : > { %434 = vmatprep.subr.mxu1 %v390_v43 }
  0xfb   : > { %435 = vmatpush1.msra.mxu1 %v389_v44 }
  0xfc   : > { %436 = vmatprep.subr.mxu1 %v388_v45 }
  0xfd   : > { %437 = vmatpush1.msra.mxu1 %v387_v46 }
  0xfe   : > { %558 = vmatmul.mubr.msk.f32.vlgmr.msra.gmra.mxu1 %vm402_vm1, %v395_v47 }
 0x1be   : > { %v472_v49 = vpop.f32.mrf.mxu1 }
 0x1bf   : > { %v473_v50 = vadd.f32 %v472_v49, %v400_v48 }
 0x1c0   : > { %v474_v51 = vpop.f32.mrf.mxu1 }
 0x1c1   : > { %590 = vtanh.f32 %v473_v50  ;;  %v475_v52 = vadd.f32 %v474_v51, %v400_v48 }
 0x1c3   : > { %592 = vtanh.f32 %v475_v52 }
 0x1ce   : > { %v591_v53 = vpop.eup %590 }
 0x1cf   : > { %479 = vst [vmem:[%s251_s15] sm:$0xff] %v591_v53 }
 0x1d0   : > { %v593_v54 = vpop.eup %592 }
 0x1d1   : > { %480 = vst [vmem:[%s251_s15 + $0x8] sm:$0xff] %v593_v54 }
 0x1d2 PF: > { %p12_p9 = scmp.ge.s32.totalorder %s667_s22, 4   ;;  %s742_s18 = smov %s612_s19 }
 0x1d3   : > { %s743_s19 = smov %s676_s25  ;;  %s744_s20 = smov %s667_s22 }
 0x1d4   :  { %14 = sbr.rel (!%p12_p9) target bundleno = 2 (0x2), region = 98 }

</bundles_post_ra>
